<compile_context>
chip_gen: v7x
topology: tpu7x:2x2x1
jax: 0.10.0
libtpu: 0.0.40
codegen_flags: <defaults>
</compile_context>

<pallas_src>
import jax
import jax.numpy as jnp
from jax.experimental import pallas as pl
from jax.experimental.pallas import tpu as pltpu

_STEPS = 4
_INDICES = (0, 1, 0, 2, 1, 3, 2, 4)                 # all skip_connect
_CONCAT = (2, 3, 4, 5)
# concat states 2..5 as affine combos  a*s0f + b*s1f :
_DAG_COEFFS = ((1.0, 1.0), (2.0, 1.0), (2.0, 2.0), (3.0, 3.0))
_EPS = 1e-5


# ----------------------------------------------------------------------------
# The single fused kernel: B batch elements per grid step.
# Everything is channels-first with pixels (H*W) on the lane axis.
# ----------------------------------------------------------------------------
def _cell_kernel(x0_ref, x1_ref, wall_ref, ball_ref, w1_ref, w2_ref, cols_ref,
                 o_ref):
    B = x0_ref.shape[0]
    C4 = w2_ref.shape[0]
    P = w1_ref.shape[0]

    # Constant-index operands: load once, outside the per-image loop.
    wall = wall_ref[...]                    # [C4+1, Cpp+Cp] preprocess+DAG+mask
    ball = ball_ref[...]                    # [C4+1, 1]
    w1 = w1_ref[...]                        # [P, C4]   channel_add conv1
    w2 = w2_ref[...]                        # [C4, P]   channel_add conv2
    cols = cols_ref[...]                    # [max(P,C4), 4] packed tiny columns
    b1 = cols[:P, 0:1]
    ln_g = cols[:P, 1:2]
    ln_b = cols[:P, 2:3]
    b2 = cols[:C4, 3:4]

    # Static unroll over the B images of this block (amortizes grid-step cost).
    for b in range(B):
        # ReLU, then merge the two preprocess inputs into one K=(Cpp+Cp) operand
        # (both halves are 8-row aligned -> cheap sublane concat).
        x = jnp.concatenate(
            [jnp.maximum(x0_ref[b], 0.0), jnp.maximum(x1_ref[b], 0.0)], axis=0)

        # One matmul: rows 0..C4-1 = cat (preprocess+BN+DAG+concat),
        #             row  C4      = attention logits (folded conv_mask).
        rows = jnp.dot(wall, x, preferred_element_type=jnp.float32) + ball
        cat = rows[:C4, :]                  # [C4, HW]
        logits = rows[C4:C4 + 1, :]         # [1, HW]

        # spatial_pool('att'): softmax over HW with deferred normalization.
        m = jnp.max(logits, axis=1, keepdims=True)
        e = jnp.exp(logits - m)             # [1, HW]
        ctx_un = jax.lax.dot_general(       # contract HW on the MXU
            cat, e, (((1,), (1,)), ((), ())),
            preferred_element_type=jnp.float32)          # [C4, 1]
        inv = pl.reciprocal(jnp.sum(e, axis=1, keepdims=True), approx=True)
        context = ctx_un * inv              # [C4, 1]

        # channel_add_conv: 1x1 conv -> LayerNorm([P,1,1]) -> ReLU -> 1x1 conv.
        t = jnp.dot(w1, context, preferred_element_type=jnp.float32) + b1
        mu = jnp.mean(t, axis=0, keepdims=True)
        var = jnp.mean((t - mu) ** 2, axis=0, keepdims=True)
        t = (t - mu) * jax.lax.rsqrt(var + _EPS) * ln_g + ln_b
        t = jnp.maximum(t, 0.0)
        add = jnp.dot(w2, t, preferred_element_type=jnp.float32) + b2   # [C4,1]

        o_ref[b] = cat + add                # broadcast add over HW lanes


# ----------------------------------------------------------------------------
# Wrapper / launch configuration.
# ----------------------------------------------------------------------------
def _vmem_limit_bytes():
    """Generation-aware VMEM budget (~50% headroom)."""
    try:
        cap = int(pltpu.get_tpu_info().vmem_capacity_bytes)
    except Exception:
        cap = 64 * 1024 * 1024              # conservative fallback
    return cap // 2                          # v7x: ~32 MiB, v5e/v6e: ~64 MiB


def _pick_batch_block(N, per_image_bytes, vmem_budget_bytes, max_b=8):
    """Images per grid step: as many as fit the budget (<= max_b), dividing N,
    while keeping >= 2 grid steps so the batch axis can shard across TCs."""
    cap = max(1, min(max_b, vmem_budget_bytes // max(per_image_bytes, 1)))
    if N >= 2:
        cap = min(cap, N // 2)
    cap = max(1, min(cap, N))
    for b in range(cap, 0, -1):
        if N % b == 0:
            return b
    return 1


def _cell_pallas(s0_cf, s1_cf, fp):
    """s0_cf: [N, C_prev_prev, HW], s1_cf: [N, C_prev, HW] (channels-first)."""
    N, Cpp, HW = s0_cf.shape
    Cp = s1_cf.shape[1]
    C4p1, Cin = fp["w_all"].shape
    C4 = C4p1 - 1
    P = fp["w1cb"].shape[0]
    R = fp["cols"].shape[0]

    vmem_limit = _vmem_limit_bytes()
    # Rough f32 footprint per image: double-buffered in/out blocks + temps.
    per_image = 4 * HW * (3 * (Cpp + Cp) + 3 * (C4 + 8))
    B = _pick_batch_block(N, per_image, vmem_limit // 2)

    const2 = lambda i: (0, 0)
    return pl.pallas_call(
        _cell_kernel,
        out_shape=jax.ShapeDtypeStruct((N, C4, HW), jnp.float32),
        grid=(N // B,),
        in_specs=[
            pl.BlockSpec((B, Cpp, HW), lambda i: (i, 0, 0)),
            pl.BlockSpec((B, Cp, HW), lambda i: (i, 0, 0)),
            pl.BlockSpec((C4p1, Cin), const2),   # folded preprocess+DAG+mask W
            pl.BlockSpec((C4p1, 1), const2),     # folded bias (+mask-row bias)
            pl.BlockSpec((P, C4), const2),       # channel_add conv1 weight
            pl.BlockSpec((C4, P), const2),       # channel_add conv2 weight
            pl.BlockSpec((R, 4), const2),        # packed b1 | ln_g | ln_b | b2
        ],
        out_specs=pl.BlockSpec((B, C4, HW), lambda i: (i, 0, 0)),
        compiler_params=pltpu.CompilerParams(
            # batch-block axis is independent -> megacore / v7x dual-TC sharding
            dimension_semantics=("parallel",),
            vmem_limit_bytes=vmem_limit,
        ),
    )(s0_cf, s1_cf, fp["w_all"], fp["b_all"], fp["w1cb"], fp["w2cb"], fp["cols"])


@jax.jit
def cell_forward(folded_params, s0, s1):
    """s0: [N, C_prev_prev, H, W], s1: [N, C_prev, H, W]  (NCHW in / NCHW out)."""
    N, Cpp, H, W = s0.shape
    Cp = s1.shape[1]
    C4 = folded_params["w2cb"].shape[0]
    # NCHW -> [N, C, H*W] is a free reshape (no transpose); pixels land on lanes.
    out = _cell_pallas(s0.reshape(N, Cpp, H * W),
                       s1.reshape(N, Cp, H * W),
                       folded_params)
    return out.reshape(N, C4, H, W)


# ----------------------------------------------------------------------------
# Parameters: module-style init, then one-time host folding.
# ----------------------------------------------------------------------------
def init_raw_params(key, C_prev_prev, C_prev, C):
    """Module-style parameters (PyTorch conventions, conv weights [out, in])."""
    ks = jax.random.split(key, 18)
    C4 = len(_CONCAT) * C
    P = int(C4 * 1)                               # ContextBlock ratio = 1

    def bn(k0, k1, k2, k3, ch):
        return dict(
            gamma=1.0 + 0.1 * jax.random.normal(k0, (ch,), jnp.float32),
            beta=0.1 * jax.random.normal(k1, (ch,), jnp.float32),
            mean=0.1 * jax.random.normal(k2, (ch,), jnp.float32),
            var=0.5 + jax.random.uniform(k3, (ch,), jnp.float32),
        )

    n = lambda k, shp: 0.1 * jax.random.normal(k, shp, jnp.float32)
    return {
        # preprocess0 / preprocess1 = ActConvBN(Cin, C, 1, 1)
        "pre0_w": n(ks[0], (C, C_prev_prev)),
        "pre0_bn": bn(ks[1], ks[2], ks[3], ks[4], C),
        "pre1_w": n(ks[5], (C, C_prev)),
        "pre1_bn": bn(ks[6], ks[7], ks[8], ks[9], C),
        # ContextBlock(C4, ratio=1)
        "cb_wm": n(ks[10], (1, C4)),
        "cb_bm": n(ks[11], (1, 1)),
        "cb_w1": n(ks[12], (P, C4)),
        "cb_b1": n(ks[13], (P,)),
        "cb_ln_g": 1.0 + 0.1 * jax.random.normal(ks[14], (P,), jnp.float32),
        "cb_ln_b": n(ks[15], (P,)),
        # NOTE: reset_parameters() zero-inits this last conv; we use a non-zero
        # init so the full compute path is exercised (intentional deviation).
        "cb_w2": n(ks[16], (C4, P)),
        "cb_b2": n(ks[17], (C4,)),
    }


def fold_cell_params(raw):
    """One-time host folding: BN -> conv weights; DAG + concat -> one weight
    matrix; conv_mask row appended (its bias is dropped: softmax-invariant);
    tiny columns packed into a single operand."""
    with jax.default_matmul_precision("highest"):
        def bn_fold(w, bn):                        # w: [Cout, Cin]
            scale = bn["gamma"] / jnp.sqrt(bn["var"] + _EPS)
            shift = bn["beta"] - bn["mean"] * scale
            return w * scale[:, None], shift

        w0f, sh0 = bn_fold(raw["pre0_w"], raw["pre0_bn"])
        w1f, sh1 = bn_fold(raw["pre1_w"], raw["pre1_bn"])
        w0_cat = jnp.concatenate([a * w0f for a, _ in _DAG_COEFFS], axis=0)
        w1_cat = jnp.concatenate([b * w1f for _, b in _DAG_COEFFS], axis=0)
        b_cat = jnp.concatenate(
            [a * sh0 + b * sh1 for a, b in _DAG_COEFFS])[:, None]      # [C4, 1]

        wm = raw["cb_wm"]                                              # [1, C4]
        w_mask = jnp.concatenate([wm @ w0_cat, wm @ w1_cat], axis=1)   # [1, Cin]
        b_mask = wm @ b_cat                                            # [1, 1]
        # NOTE: conv_mask bias (cb_bm) intentionally dropped — a constant shift
        # of every HW logit cancels under softmax.
        w_all = jnp.concatenate(
            [jnp.concatenate([w0_cat, w1_cat], axis=1), w_mask], axis=0)
        b_all = jnp.concatenate([b_cat, b_mask], axis=0)               # [C4+1,1]

        P = raw["cb_w1"].shape[0]
        C4 = w0_cat.shape[0]
        R = max(P, C4)
        cols = jnp.zeros((R, 4), jnp.float32)
        cols = cols.at[:P, 0].set(raw["cb_b1"])
        cols = cols.at[:P, 1].set(raw["cb_ln_g"])
        cols = cols.at[:P, 2].set(raw["cb_ln_b"])
        cols = cols.at[:C4, 3].set(raw["cb_b2"])

    return {
        "w_all": w_all,                            # [C4+1, Cpp+Cp]
        "b_all": b_all,                            # [C4+1, 1]
        "w1cb": raw["cb_w1"],                      # [P, C4]
        "w2cb": raw["cb_w2"],                      # [C4, P]
        "cols": cols,                              # [max(P,C4), 4]
    }


# ----------------------------------------------------------------------------
# Pure-JAX reference (mirrors the PyTorch forward, NCHW) for validation.
# ----------------------------------------------------------------------------
def cell_reference(raw, s0, s1):
    def pre(x, w, bn):
        xr = jnp.maximum(x, 0.0)
        y = jnp.einsum("oc,nchw->nohw", w, xr)
        scale = bn["gamma"] / jnp.sqrt(bn["var"] + _EPS)
        shift = bn["beta"] - bn["mean"] * scale
        return y * scale[None, :, None, None] + shift[None, :, None, None]

    s0f = pre(s0, raw["pre0_w"], raw["pre0_bn"])
    s1f = pre(s1, raw["pre1_w"], raw["pre1_bn"])
    states = [s0f, s1f]
    for i in range(_STEPS):
        states.append(states[_INDICES[2 * i]] + states[_INDICES[2 * i + 1]])
    x = jnp.concatenate([states[i] for i in _CONCAT], axis=1)     # [N, C4, H, W]

    N, C4, H, W = x.shape
    logits = (jnp.einsum("oc,nchw->nohw", raw["cb_wm"], x).reshape(N, H * W)
              + raw["cb_bm"][0, 0])
    attn = jax.nn.softmax(logits, axis=1)                         # [N, HW]
    context = jnp.einsum("ncp,np->nc", x.reshape(N, C4, H * W), attn)
    t = context @ raw["cb_w1"].T + raw["cb_b1"]
    mu = t.mean(axis=1, keepdims=True)
    var = ((t - mu) ** 2).mean(axis=1, keepdims=True)
    t = (t - mu) / jnp.sqrt(var + _EPS) * raw["cb_ln_g"] + raw["cb_ln_b"]
    t = jnp.maximum(t, 0.0)
    add = t @ raw["cb_w2"].T + raw["cb_b2"]
    return x + add[:, :, None, None]


if __name__ == "__main__":
    key = jax.random.PRNGKey(0)
    kp, k0, k1 = jax.random.split(key, 3)

    N, C_prev_prev, C_prev, C, H, W = 2, 8, 8, 4, 16, 16          # HW = 256
    raw = init_raw_params(kp, C_prev_prev, C_prev, C)
    folded = fold_cell_params(raw)
    s0 = jax.random.normal(k0, (N, C_prev_prev, H, W), jnp.float32)
    s1 = jax.random.normal(k1, (N, C_prev, H, W), jnp.float32)

    out = cell_forward(folded, s0, s1)
    jax.block_until_ready(out)
    assert out.shape == (N, len(_CONCAT) * C, H, W)

    with jax.default_matmul_precision("highest"):
        ref = cell_reference(raw, s0, s1)
    err = float(jnp.max(jnp.abs(out - ref)))
    # Tightened from 5e-2: all-f32 path; budget covers f32 accumulation-order
    # differences (~1e-4) plus the EUP approx reciprocal used for the deferred
    # softmax normalization.
    assert err < 5e-3, f"mismatch vs pure-JAX reference: max|diff|={err}"

    print("KERNEL_OK")
</pallas_src>

<mosaic_0001>
module attributes {stable_mosaic.version = 11 : i64} {
  func.func @_cell_kernel(%arg0: i32, %arg1: memref<1x8x256xf32, #tpu.memory_space<vmem>>, %arg2: memref<1x8x256xf32, #tpu.memory_space<vmem>>, %arg3: memref<17x16xf32, #tpu.memory_space<vmem>>, %arg4: memref<17x1xf32, #tpu.memory_space<vmem>>, %arg5: memref<16x16xf32, #tpu.memory_space<vmem>>, %arg6: memref<16x16xf32, #tpu.memory_space<vmem>>, %arg7: memref<16x4xf32, #tpu.memory_space<vmem>>, %arg8: memref<1x16x256xf32, #tpu.memory_space<vmem>>) attributes {dimension_semantics = [#tpu.dimension_semantics<parallel>], iteration_bounds = array<i64: 2>, scalar_prefetch = 0 : i64, scratch_operands = 0 : i64, tpu.core_type = #tpu.core_type<tc>, window_params = [{transform_indices = @transform_0, window_bounds = array<i64: 1, 8, 256>}, {transform_indices = @transform_1, window_bounds = array<i64: 1, 8, 256>}, {pipeline_mode = #tpu.pipeline_mode<synchronous>, transform_indices = @transform_2, window_bounds = array<i64: 17, 16>}, {pipeline_mode = #tpu.pipeline_mode<synchronous>, transform_indices = @transform_3, window_bounds = array<i64: 17, 1>}, {pipeline_mode = #tpu.pipeline_mode<synchronous>, transform_indices = @transform_4, window_bounds = array<i64: 16, 16>}, {pipeline_mode = #tpu.pipeline_mode<synchronous>, transform_indices = @transform_5, window_bounds = array<i64: 16, 16>}, {pipeline_mode = #tpu.pipeline_mode<synchronous>, transform_indices = @transform_6, window_bounds = array<i64: 16, 4>}, {transform_indices = @transform_7, window_bounds = array<i64: 1, 16, 256>}]} {
    %c0 = arith.constant 0 : index
    %c0_0 = arith.constant 0 : index
    %0 = vector.load %arg3[%c0, %c0_0] : memref<17x16xf32, #tpu.memory_space<vmem>>, vector<17x16xf32>
    %c0_1 = arith.constant 0 : index
    %c0_2 = arith.constant 0 : index
    %1 = vector.load %arg4[%c0_1, %c0_2] : memref<17x1xf32, #tpu.memory_space<vmem>>, vector<17x1xf32>
    %c0_3 = arith.constant 0 : index
    %c0_4 = arith.constant 0 : index
    %2 = vector.load %arg5[%c0_3, %c0_4] : memref<16x16xf32, #tpu.memory_space<vmem>>, vector<16x16xf32>
    %c0_5 = arith.constant 0 : index
    %c0_6 = arith.constant 0 : index
    %3 = vector.load %arg6[%c0_5, %c0_6] : memref<16x16xf32, #tpu.memory_space<vmem>>, vector<16x16xf32>
    %c0_7 = arith.constant 0 : index
    %c0_8 = arith.constant 0 : index
    %4 = vector.load %arg7[%c0_7, %c0_8] : memref<16x4xf32, #tpu.memory_space<vmem>>, vector<16x4xf32>
    %5 = vector.extract_strided_slice %4 {offsets = [0, 0], sizes = [16, 1], strides = [1, 1]} : vector<16x4xf32> to vector<16x1xf32>
    %6 = vector.extract_strided_slice %4 {offsets = [0, 1], sizes = [16, 1], strides = [1, 1]} : vector<16x4xf32> to vector<16x1xf32>
    %7 = vector.extract_strided_slice %4 {offsets = [0, 2], sizes = [16, 1], strides = [1, 1]} : vector<16x4xf32> to vector<16x1xf32>
    %8 = vector.extract_strided_slice %4 {offsets = [0, 3], sizes = [16, 1], strides = [1, 1]} : vector<16x4xf32> to vector<16x1xf32>
    %c0_9 = arith.constant 0 : index
    %c0_10 = arith.constant 0 : index
    %c0_11 = arith.constant 0 : index
    %9 = vector.load %arg1[%c0_9, %c0_10, %c0_11] : memref<1x8x256xf32, #tpu.memory_space<vmem>>, vector<1x8x256xf32>
    %10 = vector.shape_cast %9 : vector<1x8x256xf32> to vector<8x256xf32>
    %cst = arith.constant 0.000000e+00 : f32
    %11 = vector.broadcast %cst : f32 to vector<8x256xf32>
    %12 = arith.maximumf %10, %11 : vector<8x256xf32>
    %c0_12 = arith.constant 0 : index
    %c0_13 = arith.constant 0 : index
    %c0_14 = arith.constant 0 : index
    %13 = vector.load %arg2[%c0_12, %c0_13, %c0_14] : memref<1x8x256xf32, #tpu.memory_space<vmem>>, vector<1x8x256xf32>
    %14 = vector.shape_cast %13 : vector<1x8x256xf32> to vector<8x256xf32>
    %cst_15 = arith.constant 0.000000e+00 : f32
    %15 = vector.broadcast %cst_15 : f32 to vector<8x256xf32>
    %16 = arith.maximumf %14, %15 : vector<8x256xf32>
    %17 = tpu.concatenate %12, %16 in 0 : vector<8x256xf32>, vector<8x256xf32> -> vector<16x256xf32>
    %cst_16 = arith.constant dense<0.000000e+00> : vector<17x256xf32>
    %18 = tpu.matmul %0, %17, %cst_16 {dimension_numbers = #tpu.dot_dimension_numbers<[1], [0], [0], [1], [0, 0, 1, 1], [], []>} : vector<17x16xf32>, vector<16x256xf32>, vector<17x256xf32> -> vector<17x256xf32>
    %19 = vector.broadcast %1 : vector<17x1xf32> to vector<17x256xf32>
    %20 = arith.addf %18, %19 : vector<17x256xf32>
    %21 = vector.extract_strided_slice %20 {offsets = [0, 0], sizes = [16, 256], strides = [1, 1]} : vector<17x256xf32> to vector<16x256xf32>
    %22 = vector.extract_strided_slice %20 {offsets = [16, 0], sizes = [1, 256], strides = [1, 1]} : vector<17x256xf32> to vector<1x256xf32>
    %cst_17 = arith.constant dense<0xFF800000> : vector<1xf32>
    %23 = vector.multi_reduction <maximumf>, %22, %cst_17 [1] : vector<1x256xf32> to vector<1xf32>
    %24 = vector.shape_cast %23 : vector<1xf32> to vector<1x1xf32>
    %25 = vector.broadcast %24 : vector<1x1xf32> to vector<1x256xf32>
    %26 = arith.subf %22, %25 : vector<1x256xf32>
    %27 = math.exp %26 : vector<1x256xf32>
    %cst_18 = arith.constant dense<0.000000e+00> : vector<16x1xf32>
    %28 = tpu.matmul %21, %27, %cst_18 {dimension_numbers = #tpu.dot_dimension_numbers<[1], [1], [0], [0], [0, 0, 1, 0], [], []>} : vector<16x256xf32>, vector<1x256xf32>, vector<16x1xf32> -> vector<16x1xf32>
    %cst_19 = arith.constant dense<0.000000e+00> : vector<1xf32>
    %29 = vector.multi_reduction <add>, %27, %cst_19 [1] : vector<1x256xf32> to vector<1xf32>
    %30 = vector.shape_cast %29 : vector<1xf32> to vector<1x1xf32>
    %31 = tpu.reciprocal %30 {approx = true} : vector<1x1xf32> -> vector<1x1xf32>
    %32 = vector.broadcast %31 : vector<1x1xf32> to vector<16x1xf32>
    %33 = arith.mulf %28, %32 : vector<16x1xf32>
    %cst_20 = arith.constant dense<0.000000e+00> : vector<16x1xf32>
    %34 = tpu.matmul %2, %33, %cst_20 {dimension_numbers = #tpu.dot_dimension_numbers<[1], [0], [0], [1], [0, 0, 1, 1], [], []>} : vector<16x16xf32>, vector<16x1xf32>, vector<16x1xf32> -> vector<16x1xf32>
    %35 = arith.addf %34, %5 : vector<16x1xf32>
    %cst_21 = arith.constant dense<0.000000e+00> : vector<1xf32>
    %36 = vector.multi_reduction <add>, %35, %cst_21 [0] : vector<16x1xf32> to vector<1xf32>
    %37 = vector.shape_cast %36 : vector<1xf32> to vector<1x1xf32>
    %cst_22 = arith.constant 1.600000e+01 : f32
    %38 = vector.broadcast %cst_22 : f32 to vector<1x1xf32>
    %39 = arith.divf %37, %38 : vector<1x1xf32>
    %40 = vector.broadcast %39 : vector<1x1xf32> to vector<16x1xf32>
    %41 = arith.subf %35, %40 : vector<16x1xf32>
    %42 = arith.mulf %41, %41 : vector<16x1xf32>
    %cst_23 = arith.constant dense<0.000000e+00> : vector<1xf32>
    %43 = vector.multi_reduction <add>, %42, %cst_23 [0] : vector<16x1xf32> to vector<1xf32>
    %44 = vector.shape_cast %43 : vector<1xf32> to vector<1x1xf32>
    %cst_24 = arith.constant 1.600000e+01 : f32
    %45 = vector.broadcast %cst_24 : f32 to vector<1x1xf32>
    %46 = arith.divf %44, %45 : vector<1x1xf32>
    %47 = vector.broadcast %39 : vector<1x1xf32> to vector<16x1xf32>
    %48 = arith.subf %35, %47 : vector<16x1xf32>
    %cst_25 = arith.constant 9.99999974E-6 : f32
    %49 = vector.broadcast %cst_25 : f32 to vector<1x1xf32>
    %50 = arith.addf %46, %49 : vector<1x1xf32>
    %51 = math.rsqrt %50 : vector<1x1xf32>
    %52 = vector.broadcast %51 : vector<1x1xf32> to vector<16x1xf32>
    %53 = arith.mulf %48, %52 : vector<16x1xf32>
    %54 = arith.mulf %53, %6 : vector<16x1xf32>
    %55 = arith.addf %54, %7 : vector<16x1xf32>
    %cst_26 = arith.constant 0.000000e+00 : f32
    %56 = vector.broadcast %cst_26 : f32 to vector<16x1xf32>
    %57 = arith.maximumf %55, %56 : vector<16x1xf32>
    %cst_27 = arith.constant dense<0.000000e+00> : vector<16x1xf32>
    %58 = tpu.matmul %3, %57, %cst_27 {dimension_numbers = #tpu.dot_dimension_numbers<[1], [0], [0], [1], [0, 0, 1, 1], [], []>} : vector<16x16xf32>, vector<16x1xf32>, vector<16x1xf32> -> vector<16x1xf32>
    %59 = arith.addf %58, %8 : vector<16x1xf32>
    %60 = vector.broadcast %59 : vector<16x1xf32> to vector<16x256xf32>
    %61 = arith.addf %21, %60 : vector<16x256xf32>
    %c0_28 = arith.constant 0 : index
    %c0_29 = arith.constant 0 : index
    %c0_30 = arith.constant 0 : index
    %62 = vector.load %arg8[%c0_28, %c0_29, %c0_30] : memref<1x16x256xf32, #tpu.memory_space<vmem>>, vector<1x16x256xf32>
    %63 = vector.shape_cast %62 : vector<1x16x256xf32> to vector<16x256xf32>
    %64 = vector.shape_cast %61 : vector<16x256xf32> to vector<1x16x256xf32>
    tpu.vector_store %arg8[%c0_28, %c0_29, %c0_30], %64 {strides = array<i32>} : memref<1x16x256xf32, #tpu.memory_space<vmem>>, vector<1x16x256xf32>,
    return
  }
  func.func @transform_0(%arg0: i32) -> (i32, i32, i32) {
    %c0_i32 = arith.constant 0 : i32
    %c0_i32_0 = arith.constant 0 : i32
    %c0_i32_1 = arith.constant 0 : i32
    return %arg0, %c0_i32, %c0_i32_0 : i32, i32, i32
  }
  func.func @transform_1(%arg0: i32) -> (i32, i32, i32) {
    %c0_i32 = arith.constant 0 : i32
    %c0_i32_0 = arith.constant 0 : i32
    %c0_i32_1 = arith.constant 0 : i32
    return %arg0, %c0_i32, %c0_i32_0 : i32, i32, i32
  }
  func.func @transform_2(%arg0: i32) -> (i32, i32) {
    %c0_i32 = arith.constant 0 : i32
    %c0_i32_0 = arith.constant 0 : i32
    %c0_i32_1 = arith.constant 0 : i32
    return %c0_i32, %c0_i32_0 : i32, i32
  }
  func.func @transform_3(%arg0: i32) -> (i32, i32) {
    %c0_i32 = arith.constant 0 : i32
    %c0_i32_0 = arith.constant 0 : i32
    %c0_i32_1 = arith.constant 0 : i32
    return %c0_i32, %c0_i32_0 : i32, i32
  }
  func.func @transform_4(%arg0: i32) -> (i32, i32) {
    %c0_i32 = arith.constant 0 : i32
    %c0_i32_0 = arith.constant 0 : i32
    %c0_i32_1 = arith.constant 0 : i32
    return %c0_i32, %c0_i32_0 : i32, i32
  }
  func.func @transform_5(%arg0: i32) -> (i32, i32) {
    %c0_i32 = arith.constant 0 : i32
    %c0_i32_0 = arith.constant 0 : i32
    %c0_i32_1 = arith.constant 0 : i32
    return %c0_i32, %c0_i32_0 : i32, i32
  }
  func.func @transform_6(%arg0: i32) -> (i32, i32) {
    %c0_i32 = arith.constant 0 : i32
    %c0_i32_0 = arith.constant 0 : i32
    %c0_i32_1 = arith.constant 0 : i32
    return %c0_i32, %c0_i32_0 : i32, i32
  }
  func.func @transform_7(%arg0: i32) -> (i32, i32, i32) {
    %c0_i32 = arith.constant 0 : i32
    %c0_i32_0 = arith.constant 0 : i32
    %c0_i32_1 = arith.constant 0 : i32
    return %arg0, %c0_i32, %c0_i32_0 : i32, i32, i32
  }
}

</mosaic_0001>

<bundles_post_ra>
// kernel: cell_forward.1
= control target key start
LH: loop header
LB: loop body
LE: loop exit
PB: predicated region body
PF: predicated region fallthrough
CT: control target
= control target key end

     0   :  { %s905_s24 = smov 0   ;;  %s996_s0 = inlined_call_operand.vmem [shape: f32[2,8,256], index: 0, kind: input, shape index: {}]   ;;  %s997_s1 = inlined_call_operand.vmem [shape: f32[2,8,256], index: 1, kind: input, shape index: {}]   ;;  %s998_s2 = inlined_call_operand.vmem [shape: f32[17,16], index: 2, kind: input, shape index: {}]   ;;  %s999_s3 = inlined_call_operand.vmem [shape: f32[17,1], index: 3, kind: input, shape index: {}]   ;;  %s1000_s4 = inlined_call_operand.vmem [shape: f32[16,16], index: 4, kind: input, shape index: {}]   ;;  %s1001_s5 = inlined_call_operand.vmem [shape: f32[16,16], index: 5, kind: input, shape index: {}]   ;;  %s1002_s6 = inlined_call_operand.vmem [shape: f32[16,4], index: 6, kind: input, shape index: {}]   ;;  %s1003_s7 = inlined_call_operand.vmem [shape: f32[2,16,256], index: 7, kind: output, shape index: {}]  }
   0x1 LB: > { %s772_s25 = sadd.s32 4294967295, %s858_s24   ;;  %p776_p0 = scmp.ge.s32.totalorder %s858_s24, 1  ;;  %s858_s24 = sphi %s905_s24, %s17_s24  }
   0x2   : > { %p247_p1 = scmp.lt.s32.totalorder %s858_s24, 3 }
   0x4   : > { %p248_p2 = pnand %p776_p0, %p247_p1 }
   0x5   : > { %p284_p3 = scmp.lt.s32.totalorder (!%p248_p2), %s772_s25, 1  ;;  %v860_v0 = vmov (!%p248_p2), 0.0   ;;  %v861_v1 = vmov (!%p248_p2), 0   ;;  %v302_v2 = vld [vmem:[%s999_s3] sm:$0xff] (!%p248_p2)  ;;  %v304_v3 = vld [vmem:[%s999_s3 + $0x10] sm:$0x1] (!%p248_p2)  ;;  %v439_v35 = vlaneseq (!%p248_p2) }
   0x6   : > { %251 = sbr.rel (%p248_p2) target bundleno = 1202 (0x4b2), region = 48  ;;  %408 = vmatprep.mubr.f32.mxu0 (!%p248_p2), %v860_v0  ;;  %843 = vset.pattern.permute.xlu1 (!%p248_p2), %v861_v1  ;;  %v303_v4 = vld [vmem:[%s999_s3 + $0x8] sm:$0xff] (!%p248_p2)  ;;  %v299_v15 = vld [vmem:[%s998_s2] sm:$0xff] (!%p248_p2)  ;;  %vm334_vm0 = vcmask (!%p248_p2), 130048   ;;  %v301_v17 = vld [vmem:[%s998_s2 + $0x10] sm:$0x1] (!%p248_p2) }
   0x7   : > { %321 = vperm.xlu1 (!%p248_p2), %843, %v302_v2   ;;  %842 = vset.pattern.permute.xlu0 (!%p248_p2), %v861_v1  ;;  %v300_v16 = vld [vmem:[%s998_s2 + $0x8] sm:$0xff] (!%p248_p2)  ;;  %vm427_vm1 = vcmask (!%p248_p2), 1040384   ;;  %v440_v36 = vshrl.u32 (!%p248_p2), %v439_v35, 7  ;;  %v305_v57 = vld [vmem:[%s1000_s4] sm:$0xff] (!%p248_p2)  ;;  %s862_s30 = smov (!%p248_p2), 127   ;;  %s863_s8 = smov (!%p248_p2), 126  }
   0x8   : > { %331 = vperm.xlu0 (!%p248_p2), %842, %v304_v3   ;;  %807 = vmatprep.mubr.msk.f32.mxu1 (!%p248_p2), %vm334_vm0, %v305_v57  ;;  %v310_v58 = vld [vmem:[%s1002_s6 + $0x8] sm:$0xff] (!%p248_p2)  ;;  %v309_v59 = vld [vmem:[%s1002_s6] sm:$0xff] (!%p248_p2)  ;;  %s864_s13 = smov (!%p248_p2), 125   ;;  %vm550_vm2 = vcmask (!%p248_p2), 7168  }
   0x9   : > { %v441_v38 = vsub.s32 (!%p248_p2), 0, %v440_v36 }
   0xb   : > { %326 = vperm.xlu1 (!%p248_p2), %843, %v303_v4   ;;  %v306_v4 = vld [vmem:[%s1000_s4 + $0x8] sm:$0xff] (!%p248_p2) }
   0xd   : > { %s1005_s25 = smov (!%p284_p3, %s772_s25), 1 }
   0xe   : > { %s792_s9 = sshll.u32 %s1005_s25, 4  ;;  %s794_s16 = sshll.u32 %s1005_s25, 5 }
   0xf   : > { %s288_s12 = scalar_lea.vmem %s996_s0, %s792_s9  ;;  %s293_s15 = scalar_lea.vmem %s997_s1, %s792_s9 }
  0x10   : > { %v312_v5 = vld [vmem:[%s288_s12 + $0x8] sm:$0xff]  ;;  %v311_v7 = vld [vmem:[%s288_s12] sm:$0xff]  ;;  %s298_s19 = scalar_lea.vmem %s1003_s7, %s794_s16 }
  0x11   : > { %v316_v6 = vld [vmem:[%s293_s15 + $0x8] sm:$0xff]  ;;  %v314_v8 = vmax.f32 %v312_v5, 0.0  ;;  %v313_v10 = vmax.f32 %v311_v7, 0.0  ;;  %v315_v11 = vld [vmem:[%s293_s15] sm:$0xff] }
  0x12   : > { %v318_v9 = vmax.f32 %v316_v6, 0.0  ;;  %v317_v12 = vmax.f32 %v315_v11, 0.0  ;;  %v307_v5 = vld [vmem:[%s1001_s5] sm:$0xff] }
  0x14   : > { %v817_v13 = vpack.c.bf16 %v318_v9, %v314_v8  ;;  %v819_v14 = vpack.c.bf16 %v317_v12, %v313_v10 }
  0x16   : > { %818 = vmatprep.subr.bf16.mxu0 %v817_v13 }
  0x17   : > { %820 = vmatpush1.bf16.msra.mxu0 %v819_v14 }
  0x1a   : > { %783 = vmatmul.mubr.msk.f32.vlgmr.msra.gmra.mrb[0].mxu0 %vm334_vm0, %v299_v15 }
  0x1b   : > { %414 = vmatprep.mubr.f32.mxu0 %v860_v0 }
  0x1e   : > { %784 = vmatmul.mubr.msk.f32.gmra.mrb[2].mxu0 %vm334_vm0, %v300_v16 }
  0x1f   : > { %420 = vmatprep.mubr.f32.mxu0 %v860_v0 }
  0x22   : > { %785 = vmatmul.mubr.msk.f32.gmra.mrb[4].mxu0 %vm334_vm0, %v301_v17 }
  0x86   : > { %v322_v37 = vpop.permute.xlu1 %321 }
  0x87   : > { %v332_v22 = vpop.permute.xlu0 %331 }
  0x8a   : > { %v327_v42 = vpop.permute.xlu1 %326 }
  0xed   : > { %v410_v18 = vpop.f32.mrb[0].mxu0 }
  0xee   : > { %v412_v19 = vpop.f32.mrb[1].mxu0  ;;  %v945_v41 = vadd.f32 %v410_v18, %v322_v37 }
  0xef   : > { %v948_v45 = vadd.f32 %v412_v19, %v322_v37 }
  0xf1   : > { %v416_v20 = vpop.f32.mrb[2].mxu0 }
  0xf2   : > { %v418_v21 = vpop.f32.mrb[3].mxu0  ;;  %v952_v50 = vadd.f32 %v416_v20, %v327_v42 }
  0xf3   : > { %v954_v51 = vadd.f32 %v418_v21, %v327_v42 }
  0xf5   : > { %v422_v23 = vpop.f32.mrb[4].mxu0 }
  0xf6   : > { %v423_v24 = vadd.f32 %v422_v23, %v332_v22  ;;  %v424_v25 = vpop.f32.mrb[5].mxu0 }
  0xf7   : > { %v425_v26 = vadd.f32 %v424_v25, %v332_v22 }
  0xf8   : > { %v428_v27 = vsel %vm427_vm1, %v423_v24, -inf }
  0xf9   : > { %v429_v28 = vsel %vm427_vm1, %v425_v26, -inf }
  0xfa   : > { %v430_v29 = vmax.f32 %v428_v27, %v429_v28 }
  0xfc   : > { %431 = vmax.xlane.f32.xlu0 %v430_v29 }
 0x189   : > { %v432_v30 = vpop.xlane.xlu0 %431 }
 0x18a   : > { %v433_v31 = vsub.f32 %v423_v24, %v432_v30  ;;  %v434_v32 = vsub.f32 %v425_v26, %v432_v30 }
 0x18c   : > { %v435_v33 = vmul.f32 1.442695, %v433_v31  ;;  %v437_v34 = vmul.f32 1.442695, %v434_v32 }
 0x18e   : > { %844 = vpow2.f32 %v435_v33 }
 0x18f   : > { %846 = vpow2.f32 %v437_v34 }
 0x198   : > { %v845_v39 = vpop.eup %844 }
 0x199   : > { %v847_v40 = vpop.eup %846  ;;  %v457_v43 = vsel %vm427_vm1, %v845_v39, 0.0  ;;  %v442_v44 = vrot.slane %v845_v39, %v441_v38 }
 0x19a   : > { %v458_v46 = vsel %vm427_vm1, %v847_v40, 0.0  ;;  %v446_v47 = vrot.slane %v847_v40, %v441_v38 }
 0x19b   : > { %v459_v48 = vadd.f32 %v458_v46, %v457_v43  ;;  %v447_v49 = vmul.f32 %v442_v44, %v945_v41  ;;  %v449_v54 = vmul.f32 %v442_v44, %v952_v50 }
 0x19c   : > { %v448_v52 = vmul.f32 %v446_v47, %v948_v45  ;;  %v450_v55 = vmul.f32 %v446_v47, %v954_v51 }
 0x19d   : > { %460 = vadd.xlane.f32.xlu1 %v459_v48 }
 0x19e   : > { %v451_v53 = vadd.f32 %v448_v52, %v447_v49  ;;  %v454_v56 = vadd.f32 %v450_v55, %v449_v54 }
 0x1a0   : > { %452 = vadd.xlane.f32.xlu0 %v451_v53  ;;  %v308_v53 = vld [vmem:[%s1001_s5 + $0x8] sm:$0xff] }
 0x1a4   : > { %455 = vadd.xlane.f32.xlu0 %v454_v56 }
 0x1ae   : > { %584 = vrot.lane.b32.xlu1 %v310_v58, %s862_s30 }
 0x1b2   : > { %590 = vrot.lane.b32.xlu1 %v309_v59, %s863_s8 }
 0x1b6   : > { %600 = vrot.lane.b32.xlu1 %v309_v59, %s864_s13 }
 0x1ba   : > { %582 = vrot.lane.b32.xlu0 %v309_v59, %s862_s30 }
 0x1be   : > { %592 = vrot.lane.b32.xlu0 %v310_v58, %s863_s8 }
 0x1c2   : > { %602 = vrot.lane.b32.xlu0 %v310_v58, %s864_s13 }
 0x22a   : > { %v461_v60 = vpop.xlane.xlu1 %460 }
 0x22b   : > { %848 = vrcp.f32 %v461_v60 }
 0x22d   : > { %v453_v61 = vpop.xlane.xlu0 %452 }
 0x22e   : > { %v585_v35 = vpop.permute.xlu1 %584 }
 0x231   : > { %v456_v0 = vpop.xlane.xlu0 %455 }
 0x232   : > { %v591_v40 = vpop.permute.xlu1 %590 }
 0x235   : > { %v849_v62 = vpop.eup %848  ;;  %v583_v36 = vpop.permute.xlu0 %582 }
 0x236   : > { %v466_v63 = vrot.slane %v849_v62, %v441_v38  ;;  %v601_v55 = vpop.permute.xlu1 %600 }
 0x238   : > { %v467_v1 = vmul.f32 %v466_v63, %v453_v61  ;;  %v468_v2 = vmul.f32 %v466_v63, %v456_v0 }
 0x239   : > { %v593_v42 = vpop.permute.xlu0 %592 }
 0x23a   : > { %v821_v3 = vpack.c.bf16 %v468_v2, %v467_v1 }
 0x23c   : > { %822 = vmatprep.subr.bf16.mxu1 %v821_v3 }
 0x23d   : > { %824 = vmatpush3.bf16.msra.mxu1 %v821_v3  ;;  %v603_v54 = vpop.permute.xlu0 %602 }
 0x240   : > { %808 = vmatmul.mubr.msk.f32.vlgmr.msra.gmra.mrb[0].mxu1 %vm334_vm0, %v306_v4 }
 0x241   : > { %814 = vmatprep.mubr.msk.f32.mxu1 %vm334_vm0, %v307_v5 }
 0x313   : > { %v809_v6 = vpop.f32.mrb[0].mxu1 }
 0x314   : > { %v547_v7 = vadd.f32 %v809_v6, %v310_v58  ;;  %v541_v8 = vpop.f32.mrb[1].mxu1 }
 0x315   : > { %v542_v9 = vadd.f32 %v541_v8, %v309_v59 }
 0x316   : > { %v552_v10 = vsel %vm550_vm2, %v547_v7, 0.0 }
 0x317   : > { %v551_v11 = vsel %vm550_vm2, %v542_v9, 0.0 }
 0x318   : > { %v553_v12 = vadd.f32 %v552_v10, %v551_v11 }
 0x31a   : > { %v554_v13 = vrot.slane %v553_v12, 4 }
 0x31c   : > { %v555_v14 = vadd.f32 %v554_v13, %v553_v12 }
 0x31e   : > { %v556_v15 = vrot.slane %v555_v14, 2 }
 0x320   : > { %v557_v16 = vadd.f32 %v556_v15, %v555_v14 }
 0x322   : > { %v558_v17 = vrot.slane %v557_v16, 1 }
 0x324   : > { %v559_v18 = vadd.f32 %v558_v17, %v557_v16 }
 0x326   : > { %v561_v19 = vmul.f32 0.0625, %v559_v18 }
 0x328   : > { %v562_v20 = vsub.f32 %v542_v9, %v561_v19  ;;  %v563_v21 = vsub.f32 %v547_v7, %v561_v19 }
 0x32a   : > { %v564_v22 = vmul.f32 %v562_v20, %v562_v20  ;;  %v565_v23 = vmul.f32 %v563_v21, %v563_v21 }
 0x32c   : > { %v566_v24 = vsel %vm550_vm2, %v564_v22, 0.0  ;;  %v567_v25 = vsel %vm550_vm2, %v565_v23, 0.0 }
 0x32d   : > { %v568_v26 = vadd.f32 %v567_v25, %v566_v24 }
 0x32f   : > { %v569_v27 = vrot.slane %v568_v26, 4 }
 0x331   : > { %v570_v28 = vadd.f32 %v569_v27, %v568_v26 }
 0x333   : > { %v571_v29 = vrot.slane %v570_v28, 2 }
 0x335   : > { %v572_v30 = vadd.f32 %v571_v29, %v570_v28 }
 0x337   : > { %v573_v31 = vrot.slane %v572_v30, 1 }
 0x339   : > { %v574_v32 = vadd.f32 %v573_v31, %v572_v30 }
 0x33b   : > { %v575_v33 = vmul.f32 0.0625, %v574_v32 }
 0x33d   : > { %v576_v34 = vadd.f32 1e-05, %v575_v33 }
 0x33f   : > { %850 = vrsqrt.f32 %v576_v34 }
 0x349   : > { %v851_v37 = vpop.eup %850 }
 0x34a   : > { %v579_v38 = vmul.f32 %v851_v37, %v563_v21  ;;  %v578_v39 = vmul.f32 %v851_v37, %v562_v20 }
 0x34c   : > { %v589_v43 = vmul.f32 %v585_v35, %v579_v38  ;;  %v588_v44 = vmul.f32 %v583_v36, %v578_v39 }
 0x34e   : > { %v596_v46 = vadd.f32 %v591_v40, %v588_v44  ;;  %v597_v47 = vadd.f32 %v593_v42, %v589_v43 }
 0x350   : > { %v598_v48 = vmax.f32 %v596_v46, 0.0  ;;  %v599_v49 = vmax.f32 %v597_v47, 0.0 }
 0x352   : > { %v825_v52 = vpack.c.bf16 %v599_v49, %v598_v48 }
 0x354   : > { %826 = vmatprep.subr.bf16.mxu1 %v825_v52 }
 0x355   : > { %828 = vmatpush3.bf16.msra.mxu1 %v825_v52 }
 0x358   : > { %815 = vmatmul.mubr.msk.f32.vlgmr.msra.gmra.mrb[2].mxu1 %vm334_vm0, %v308_v53 }
 0x42b   : > { %v816_v56 = vpop.f32.mrb[2].mxu1 }
 0x42c   : > { %v684_v57 = vadd.f32 %v816_v56, %v603_v54  ;;  %v678_v58 = vpop.f32.mrb[3].mxu1 }
 0x42d   : > { %v679_v59 = vadd.f32 %v678_v58, %v601_v55 }
 0x42e   : > { %694 = vperm.xlu0 %842, %v684_v57  }
 0x42f   : > { %689 = vperm.xlu1 %843, %v679_v59  }
 0x4ad   : > { %v695_v60 = vpop.permute.xlu0 %694 }
 0x4ae   : > { %v699_v61 = vadd.f32 %v695_v60, %v952_v50  ;;  %v700_v62 = vadd.f32 %v695_v60, %v954_v51  ;;  %v690_v63 = vpop.permute.xlu1 %689 }
 0x4af   : > { %v697_v0 = vadd.f32 %v690_v63, %v945_v41  ;;  %v698_v1 = vadd.f32 %v690_v63, %v948_v45 }
 0x4b0   : > { %703 = vst [vmem:[%s298_s19 + $0x10] sm:$0xff] %v699_v61  ;;  %704 = vst [vmem:[%s298_s19 + $0x18] sm:$0xff] %v700_v62 }
 0x4b1   : > { %701 = vst [vmem:[%s298_s19] sm:$0xff] %v697_v0  ;;  %702 = vst [vmem:[%s298_s19 + $0x8] sm:$0xff] %v698_v1 }
 0x4b2 PF: > { %s17_s24 = sadd.s32 1, %s858_s24  }
 0x4b3   : > { %p14_p4 = scmp.ge.s32.totalorder %s17_s24, 4  }
 0x4b5   :  { %16 = sbr.rel (!%p14_p4) target bundleno = 1 (0x1), region = 81 }

</bundles_post_ra>
